<compile_context>
chip_gen: v7x
topology: tpu7x:2x2x1
jax: 0.10.0
libtpu: 0.0.40
codegen_flags: <defaults>
</compile_context>

<pallas_src>
import functools

import jax
import jax.numpy as jnp
from jax import lax
from jax.experimental import pallas as pl
from jax.experimental.pallas import tpu as pltpu


# ----------------------- Kernel 1: tiled BatchNorm1d statistics -----------------------
def bn_stats_kernel(x_ref, stats_ref, *, n_rows, eps):
    # x_ref:    (B, Tc, F) chunk of the transposed input
    # stats_ref:(2, F) resident output block; used as the running [sum; sum_sq] accumulator,
    #           converted to [mean; rstd] on the last grid step.
    i = pl.program_id(0)

    @pl.when(i == 0)
    def _init():
        stats_ref[...] = jnp.zeros_like(stats_ref)

    b, tc, f = x_ref.shape
    x = x_ref[...].reshape(b * tc, f)                         # rows of the (T*B, F) slab
    stats_ref[0:1, :] += jnp.sum(x, axis=0, keepdims=True)    # sum   (f32)
    stats_ref[1:2, :] += jnp.sum(x * x, axis=0, keepdims=True)  # sum_sq (f32)

    @pl.when(i == pl.num_programs(0) - 1)
    def _finalize():
        inv_n = 1.0 / n_rows
        mean = stats_ref[0:1, :] * inv_n
        ex2 = stats_ref[1:2, :] * inv_n
        var = ex2 - mean * mean                               # biased variance (PyTorch BN)
        stats_ref[0:1, :] = mean
        stats_ref[1:2, :] = lax.rsqrt(var + eps)


def bn_stats(xt, *, t_chunk, eps):
    # xt: (B, T, F) -> stats (2, F) = [mean; rstd]
    B, T, F = xt.shape
    kernel = functools.partial(bn_stats_kernel, n_rows=float(T * B), eps=eps)
    return pl.pallas_call(
        kernel,
        out_shape=jax.ShapeDtypeStruct((2, F), jnp.float32),
        grid_spec=pltpu.PrefetchScalarGridSpec(
            num_scalar_prefetch=0,
            grid=(T // t_chunk,),
            in_specs=[pl.BlockSpec((B, t_chunk, F), lambda i: (0, i, 0))],
            out_specs=pl.BlockSpec((2, F), lambda i: (0, 0)),
        ),
        compiler_params=pltpu.CompilerParams(
            dimension_semantics=("arbitrary",)),   # running reduction across tiles
    )(xt)


# -------------------- Kernel 2: fused BN-normalize + Linear (bias=False) --------------------
def bn_linear_kernel(x_ref, stats_ref, gamma_ref, beta_ref, w_ref, o_ref):
    # x_ref:   (B, Tc, F) f32 input chunk
    # stats_ref:(2, F)   f32 [mean; rstd]
    # gamma/beta: (1, F) f32 BN affine params
    # w_ref:   (F, O)    bf16 Linear weight (transposed, resident across the grid)
    # o_ref:   (B, Tc, O) f32 lane-dense output chunk
    b, tc, f = x_ref.shape
    out_f = o_ref.shape[-1]

    # Fold BN into a single per-feature scale/shift (f32, VPU).
    scale = stats_ref[1:2, :] * gamma_ref[...]                # (1, F)
    shift = beta_ref[...] - stats_ref[0:1, :] * scale         # (1, F)

    x = x_ref[...].reshape(b * tc, f)                         # (rows, F), contiguous merge
    xn = x * scale + shift                                    # f32 elementwise normalize

    # One large MXU matmul per chunk: bf16 operands, f32 accumulation.
    y = jnp.dot(xn.astype(jnp.bfloat16), w_ref[...],
                preferred_element_type=jnp.float32)           # (rows, O)

    o_ref[...] = y.reshape(b, tc, out_f).astype(o_ref.dtype)


def bn_linear(xt, stats, gamma, beta, w_bf16, *, t_chunk):
    # xt: (B, T, F) -> (B, T, O)
    B, T, F = xt.shape
    O = w_bf16.shape[1]
    return pl.pallas_call(
        bn_linear_kernel,
        out_shape=jax.ShapeDtypeStruct((B, T, O), jnp.float32),
        grid_spec=pltpu.PrefetchScalarGridSpec(
            num_scalar_prefetch=0,
            grid=(T // t_chunk,),
            in_specs=[
                pl.BlockSpec((B, t_chunk, F), lambda i: (i and 0, i, 0) if False else (0, i, 0)),
                pl.BlockSpec((2, F), lambda i: (0, 0)),
                pl.BlockSpec((1, F), lambda i: (0, 0)),
                pl.BlockSpec((1, F), lambda i: (0, 0)),
                # NOTE: for large F*O weights, add pipeline_mode=pl.Buffered(1) here to keep
                # the grid-invariant weight single-buffered (VMEM headroom on v7x's 64 MiB).
                pl.BlockSpec((F, O), lambda i: (0, 0)),
            ],
            out_specs=pl.BlockSpec((B, t_chunk, O), lambda i: (0, i, 0)),
        ),
        compiler_params=pltpu.CompilerParams(
            dimension_semantics=("parallel",)),    # independent row tiles (v7x: both TCs)
    )(xt, stats, gamma, beta, w_bf16)


# ------------------------------- Full module forward -------------------------------
def _time_chunk(T, B, target_rows=512):
    """Largest divisor of T with ~target_rows rows per matmul tile (VMEM-friendly)."""
    tc = max(1, min(T, target_rows // max(B, 1)))
    while T % tc:
        tc -= 1
    return tc


def sequence_wise_classifier_forward(x, gamma, beta, w_t, *, eps=1e-5, t_chunk=None):
    """x: (T, B, F), gamma/beta: (1, F), w_t: (F, O) (= PyTorch weight.T) -> (B, T, O)."""
    T, B, F = x.shape
    tc = t_chunk if t_chunk is not None else _time_chunk(T, B)
    assert T % tc == 0, "time chunk must divide T"

    # One-time layout plumbing: put batch in front so kernel blocks and the final output
    # are contiguous & lane-dense; this also fuses the module's x.transpose(0, 1).
    xt = jnp.transpose(x, (1, 0, 2))                          # (B, T, F)

    stats = bn_stats(xt, t_chunk=tc, eps=eps)                 # (2, F) = [mean; rstd]
    w_bf16 = w_t.astype(jnp.bfloat16)                         # cast weights once for the MXU
    return bn_linear(xt, stats, gamma, beta, w_bf16, t_chunk=tc)


# ------------------------------- Pure-JAX reference -------------------------------
def reference_forward(x, gamma, beta, w_t, eps=1e-5, mxu_dtype=jnp.float32):
    T, B, F = x.shape
    x2 = x.reshape(T * B, F)
    mean = x2.mean(0, keepdims=True)
    var = ((x2 - mean) ** 2).mean(0, keepdims=True)           # biased variance
    xn = (x2 - mean) / jnp.sqrt(var + eps) * gamma + beta
    y = jnp.dot(xn.astype(mxu_dtype), w_t.astype(mxu_dtype),
                preferred_element_type=jnp.float32)
    y = y.reshape(T, B, -1)
    return jnp.transpose(y, (1, 0, 2)).astype(jnp.float32)    # (B, T, O); training: no softmax


# --------------------------------------- Main -------------------------------------
if __name__ == "__main__":
    # Small but TPU-shaped: F and O are lane-dense (multiples of 128), T*B rows tile by 8.
    T, B, IN_F, OUT_F = 16, 8, 128, 128

    key = jax.random.PRNGKey(0)
    k_x, k_g, k_b, k_w = jax.random.split(key, 4)

    x = jax.random.normal(k_x, (T, B, IN_F), dtype=jnp.float32)

    # BatchNorm1d affine params (deterministic, non-trivial).
    gamma = 1.0 + 0.1 * jax.random.normal(k_g, (1, IN_F), dtype=jnp.float32)
    beta = 0.1 * jax.random.normal(k_b, (1, IN_F), dtype=jnp.float32)

    # Linear(bias=False) weight, PyTorch shape (out, in), init U(-1/sqrt(in), 1/sqrt(in));
    # stored transposed for right-multiplication.
    bound = 1.0 / (IN_F ** 0.5)
    w = jax.random.uniform(k_w, (OUT_F, IN_F), minval=-bound, maxval=bound, dtype=jnp.float32)
    w_t = w.T                                                  # (IN_F, OUT_F)

    out = sequence_wise_classifier_forward(x, gamma, beta, w_t, t_chunk=8)
    out = jax.block_until_ready(out)
    assert out.shape == (B, T, OUT_F)

    # Tight check vs. a reference that matches the kernel's bf16 MXU operands ...
    ref_bf16 = reference_forward(x, gamma, beta, w_t, mxu_dtype=jnp.bfloat16)
    err_bf16 = float(jnp.max(jnp.abs(out - ref_bf16)))
    assert jnp.allclose(out, ref_bf16, atol=5e-3, rtol=5e-3), err_bf16

    # ... and a looser check vs. the pure-f32 reference (bf16 operand rounding only).
    ref_f32 = reference_forward(x, gamma, beta, w_t)
    err_f32 = float(jnp.max(jnp.abs(out - ref_f32)))
    assert jnp.allclose(out, ref_f32, atol=3e-2, rtol=3e-2), err_f32

    print("KERNEL_OK")
</pallas_src>

<mosaic_0001>
module attributes {stable_mosaic.version = 11 : i64} {
  func.func @bn_stats_kernel(%arg0: i32, %arg1: memref<8x8x128xf32, #tpu.memory_space<vmem>>, %arg2: memref<2x128xf32, #tpu.memory_space<vmem>>) attributes {dimension_semantics = [#tpu.dimension_semantics<arbitrary>], iteration_bounds = array<i64: 2>, scalar_prefetch = 0 : i64, scratch_operands = 0 : i64, tpu.core_type = #tpu.core_type<tc>, window_params = [{transform_indices = @transform_0, window_bounds = array<i64: 8, 8, 128>}, {pipeline_mode = #tpu.pipeline_mode<synchronous>, transform_indices = @transform_1, window_bounds = array<i64: 2, 128>}]} {
    %c0_i32 = arith.constant 0 : i32
    %0 = arith.cmpi eq, %arg0, %c0_i32 : i32
    %1 = arith.extui %0 : i1 to i32
    %c0_i32_0 = arith.constant 0 : i32
    %2 = arith.cmpi ne, %1, %c0_i32_0 : i32
    scf.if %2 {
      %cst_12 = arith.constant 0.000000e+00 : f32
      %19 = vector.broadcast %cst_12 : f32 to vector<2x128xf32>
      %c0_13 = arith.constant 0 : index
      %c0_14 = arith.constant 0 : index
      %20 = vector.load %arg2[%c0_13, %c0_14] : memref<2x128xf32, #tpu.memory_space<vmem>>, vector<2x128xf32>
      tpu.vector_store %arg2[%c0_13, %c0_14], %19 {strides = array<i32>} : memref<2x128xf32, #tpu.memory_space<vmem>>, vector<2x128xf32>,
    } else {
    }
    %c0 = arith.constant 0 : index
    %c0_1 = arith.constant 0 : index
    %c0_2 = arith.constant 0 : index
    %3 = vector.load %arg1[%c0, %c0_1, %c0_2] : memref<8x8x128xf32, #tpu.memory_space<vmem>>, vector<8x8x128xf32>
    %4 = vector.shape_cast %3 : vector<8x8x128xf32> to vector<64x128xf32>
    %c0_3 = arith.constant 0 : index
    %c0_4 = arith.constant 0 : index
    %5 = vector.load %arg2[%c0_3, %c0_4] : memref<2x128xf32, #tpu.memory_space<vmem>>, vector<1x128xf32>
    %cst = arith.constant dense<0.000000e+00> : vector<128xf32>
    %6 = vector.multi_reduction <add>, %4, %cst [0] : vector<64x128xf32> to vector<128xf32>
    %7 = vector.shape_cast %6 : vector<128xf32> to vector<1x128xf32>
    %8 = arith.addf %5, %7 : vector<1x128xf32>
    %c0_5 = arith.constant 0 : index
    %c0_6 = arith.constant 0 : index
    %9 = vector.load %arg2[%c0_5, %c0_6] : memref<2x128xf32, #tpu.memory_space<vmem>>, vector<1x128xf32>
    tpu.vector_store %arg2[%c0_5, %c0_6], %8 {strides = array<i32>} : memref<2x128xf32, #tpu.memory_space<vmem>>, vector<1x128xf32>,
    %c1 = arith.constant 1 : index
    %c0_7 = arith.constant 0 : index
    %10 = vector.load %arg2[%c1, %c0_7] : memref<2x128xf32, #tpu.memory_space<vmem>>, vector<1x128xf32>
    %11 = arith.mulf %4, %4 : vector<64x128xf32>
    %cst_8 = arith.constant dense<0.000000e+00> : vector<128xf32>
    %12 = vector.multi_reduction <add>, %11, %cst_8 [0] : vector<64x128xf32> to vector<128xf32>
    %13 = vector.shape_cast %12 : vector<128xf32> to vector<1x128xf32>
    %14 = arith.addf %10, %13 : vector<1x128xf32>
    %c1_9 = arith.constant 1 : index
    %c0_10 = arith.constant 0 : index
    %15 = vector.load %arg2[%c1_9, %c0_10] : memref<2x128xf32, #tpu.memory_space<vmem>>, vector<1x128xf32>
    tpu.vector_store %arg2[%c1_9, %c0_10], %14 {strides = array<i32>} : memref<2x128xf32, #tpu.memory_space<vmem>>, vector<1x128xf32>,
    %c1_i32 = arith.constant 1 : i32
    %16 = arith.cmpi eq, %arg0, %c1_i32 : i32
    %17 = arith.extui %16 : i1 to i32
    %c0_i32_11 = arith.constant 0 : i32
    %18 = arith.cmpi ne, %17, %c0_i32_11 : i32
    scf.if %18 {
      %c0_12 = arith.constant 0 : index
      %c0_13 = arith.constant 0 : index
      %19 = vector.load %arg2[%c0_12, %c0_13] : memref<2x128xf32, #tpu.memory_space<vmem>>, vector<1x128xf32>
      %cst_14 = arith.constant 7.812500e-03 : f32
      %20 = vector.broadcast %cst_14 : f32 to vector<1x128xf32>
      %21 = arith.mulf %19, %20 : vector<1x128xf32>
      %c1_15 = arith.constant 1 : index
      %c0_16 = arith.constant 0 : index
      %22 = vector.load %arg2[%c1_15, %c0_16] : memref<2x128xf32, #tpu.memory_space<vmem>>, vector<1x128xf32>
      %cst_17 = arith.constant 7.812500e-03 : f32
      %23 = vector.broadcast %cst_17 : f32 to vector<1x128xf32>
      %24 = arith.mulf %22, %23 : vector<1x128xf32>
      %25 = arith.mulf %21, %21 : vector<1x128xf32>
      %26 = arith.subf %24, %25 : vector<1x128xf32>
      %c0_18 = arith.constant 0 : index
      %c0_19 = arith.constant 0 : index
      %27 = vector.load %arg2[%c0_18, %c0_19] : memref<2x128xf32, #tpu.memory_space<vmem>>, vector<1x128xf32>
      tpu.vector_store %arg2[%c0_18, %c0_19], %21 {strides = array<i32>} : memref<2x128xf32, #tpu.memory_space<vmem>>, vector<1x128xf32>,
      %cst_20 = arith.constant 9.99999974E-6 : f32
      %28 = vector.broadcast %cst_20 : f32 to vector<1x128xf32>
      %29 = arith.addf %26, %28 : vector<1x128xf32>
      %30 = math.rsqrt %29 : vector<1x128xf32>
      %c1_21 = arith.constant 1 : index
      %c0_22 = arith.constant 0 : index
      %31 = vector.load %arg2[%c1_21, %c0_22] : memref<2x128xf32, #tpu.memory_space<vmem>>, vector<1x128xf32>
      tpu.vector_store %arg2[%c1_21, %c0_22], %30 {strides = array<i32>} : memref<2x128xf32, #tpu.memory_space<vmem>>, vector<1x128xf32>,
    } else {
    }
    return
  }
  func.func @transform_0(%arg0: i32) -> (i32, i32, i32) {
    %c0_i32 = arith.constant 0 : i32
    %c0_i32_0 = arith.constant 0 : i32
    %c0_i32_1 = arith.constant 0 : i32
    return %c0_i32, %arg0, %c0_i32_0 : i32, i32, i32
  }
  func.func @transform_1(%arg0: i32) -> (i32, i32) {
    %c0_i32 = arith.constant 0 : i32
    %c0_i32_0 = arith.constant 0 : i32
    %c0_i32_1 = arith.constant 0 : i32
    return %c0_i32, %c0_i32_0 : i32, i32
  }
}

</mosaic_0001>

<bundles_post_ra>
// kernel: tpu_custom_call.1
= control target key start
LH: loop header
LB: loop body
LE: loop exit
PB: predicated region body
PF: predicated region fallthrough
CT: control target
= control target key end

     0   :  { %6 = vsyncpa [#allocation3], 0  ;;  %s549_s0 = inlined_call_operand.hbm [shape: f32[8,16,128], index: 0, kind: input, shape index: {}]   ;;  %s550_s1 = inlined_call_operand.hbm [shape: f32[2,128], index: 1, kind: output, shape index: {}]  }
   0x1   :  { %8 = vsyncpa [#allocation3 + $0x1], 0 }
   0x2   :  { %9 = vsyncpa [#allocation4], 0  ;;  %s423_s6 = smov 0   ;;  %s425_s7 = smov 0  }
   0x3   :  { %s427_s8 = smov 0   ;;  %s429_s9 = smov 0  }
   0x4 LB: > { %s442_s10 = sadd.s32 4294967295, %s405_s9   ;;  %s445_s11 = sadd.s32 1, %s405_s9   ;;  %s405_s9 = sphi %s429_s9, %s556_s9   ;;  %s401_s8 = sphi %s427_s8, %s555_s8   ;;  %s397_s7 = sphi %s425_s7, %s554_s7   ;;  %s393_s6 = sphi %s423_s6, %s553_s6  }
   0x5   : > { %s19_s12 = ssub.s32 %s405_s9, %s445_s11  ;;  %s22_s13 = sadd.s32 1, %s401_s8 }
   0x6   : > { %p20_p0 = scmp.eq.s32.totalorder %s19_s12, 0  ;;  %p29_p1 = scmp.ne.s32.totalorder %s401_s8, %s397_s7 }
   0x7   : > { %p30_p2 = scmp.eq.s32.totalorder %s405_s9, 0  ;;  %p35_p3 = scmp.ne.s32.totalorder %s397_s7, %s393_s6 }
   0x8   : > { %s455_s14 = scalar_select %p20_p0, %s401_s8, %s22_s13  }
   0x9   : > { %p31_p4 = por %p30_p2, %p29_p1  ;;  %p36_p5 = scmp.eq.s32.totalorder %s442_s10, 0 }
   0xa   : > { %p269_p6 = scmp.lt.s32.totalorder %s405_s9, 2  ;;  %s80_s16 = sand.u32 1, %s401_s8  }
   0xb   : > { %p459_p7 = por %p36_p5, %p35_p3  ;;  %s249_s17 = sshll.u32 %s80_s16, 6 }
   0xc   : > { %s250_s18 = sshll.u32 %s405_s9, 7  ;;  %s84_s22 = scalar_lea.vmem [#allocation2], %s249_s17 }
   0xd   : > { %s468_s21 = scalar_lea.hbm %s549_s0, %s250_s18  ;;  %s90_s23 = sshll.u32 %s84_s22, 4  ;;  %s470_s23 = int_to_ptr.vmem [resolvable:$true] %s90_s23 }
   0xe   : > { %p472_p8 = pnand %p269_p6, %p31_p4  ;;  %s476_s25 = scalar_lea.sflag [#allocation3], %s80_s16 }
   0xf   : > { %s311_s26 = scalar_lea.hbm %s468_s21, 1024  ;;  %s316_s29 = scalar_lea.hbm %s549_s0, 2048 }
  0x10   : > { %p312_p9 = scmp.ne.s32.totalorder %s468_s21, %s311_s26  ;;  %p313_p10 = pneg %p472_p8 }
  0x11   : > { %p317_p13 = scmp.lt.u32.totalorder %s468_s21, %s549_s0  ;;  %p318_p0 = scmp.lt.u32.totalorder %s316_s29, %s311_s26 }
  0x12   : > { %p314_p11 = pnand %p313_p10, %p312_p9  ;;  %p320_p2 = scmp.lt.u32.totalorder %s311_s26, %s468_s21 }
  0x13   : > { %p319_p1 = por %p318_p0, %p317_p13 }
  0x14   : > { %p315_p12 = pneg %p314_p11 }
  0x15   : > { %p321_p3 = por %p320_p2, %p319_p1 }
  0x17   : > { %p322_p4 = pnand %p321_p3, %p315_p12 }
  0x19   : > { %325 = shalt.err (!%p322_p4)
}
  0x1a   : > { %s326_s3 = scalar_lea.vmem %s470_s23, 1024  ;;  %s407_s4 = smov [#allocation2]  }
  0x1b   : > { %p327_p5 = scmp.ne.s32.totalorder %s470_s23, %s326_s3  ;;  %s331_s5 = sshll.u32 %s407_s4, 4  ;;  %s332_s5 = int_to_ptr.vmem [resolvable:$false] %s331_s5 }
  0x1c   : > { %s333_s6 = scalar_lea.vmem %s332_s5, 2048  ;;  %p334_p11 = scmp.lt.s32.totalorder %s470_s23, %s332_s5 }
  0x1d   : > { %p329_p6 = pnand %p327_p5, %p313_p10  ;;  %p335_p13 = scmp.lt.s32.totalorder %s333_s6, %s326_s3 }
  0x1f   : > { %p330_p9 = pneg %p329_p6  ;;  %p336_p0 = por %p335_p13, %p334_p11 }
  0x21   : > { %p337_p1 = pnand %p336_p0, %p330_p9 }
  0x23   : > { %340 = shalt.err (!%p337_p1)
}
  0x24   : > { %s408_s12 = smov 256   ;;  %s409_s13 = smov 128  }
  0x25   : > { %s410_s16 = smov 8   ;;  %p251_p10 = scmp.ge.s32.totalorder %s405_s9, 1 }
  0x26   : > { %268 = dma.hbm_to_vmem [thread:$0]  (!%p472_p8), %s468_s21, 1024, %s470_s23, %s476_s25, %s408_s12, %s409_s13, %s410_s16  }
  0x27   : > { %p98_p12 = scmp.lt.s32.totalorder %s405_s9, 3 }
  0x29   : > { %p99_p2 = pnand %p251_p10, %p98_p12 }
  0x2a   : > { %s104_s17 = sand.u32 (!%p99_p2), 1, %s397_s7  }
  0x2b   : > { %102 = sbr.rel (%p99_p2) target bundleno = 142 (0x8e), region = 24  ;;  %s252_s18 = sshll.u32 (!%p99_p2), %s104_s17, 6 }
  0x2c   : > { %s105_s19 = scalar_lea.sflag (!%p99_p2), [#allocation3], %s104_s17  ;;  %s108_s20 = scalar_lea.vmem (!%p99_p2), [#allocation2], %s252_s18 }
  0x32   : > { %384 = dma.done.wait (%p459_p7), %s105_s19, 1024  }
  0x33   : > { %386 = vsyncadd (%p459_p7), %s105_s19, 4294966272  ;;  %p253_p3 = scmp.ne.s32.totalorder %s442_s10, 0 }
  0x34   : > { %v411_v0 = vmov (!%p253_p3), 0.0  }
  0x35   : > { %125 = sbr.rel (%p253_p3) target bundleno = 60 (0x3c), region = 32  ;;  %126 = vst [vmem:[#allocation5] sm:$0x3] (!%p253_p3), %v411_v0 }
  0x3c PF: > { %v127_v1 = vld [vmem:[%s108_s20] sm:$0xff]  ;;  %v128_v2 = vld [vmem:[%s108_s20 + $0x8] sm:$0xff]  ;;  %v129_v3 = vld [vmem:[%s108_s20 + $0x10] sm:$0xff]  ;;  %p254_p7 = scmp.ne.s32.totalorder %s442_s10, 1 }
  0x3d   : > { %v130_v4 = vld [vmem:[%s108_s20 + $0x18] sm:$0xff]  ;;  %v136_v5 = vadd.f32 %v128_v2, %v127_v1  ;;  %v152_v6 = vmul.f32 %v127_v1, %v127_v1  ;;  %v153_v7 = vmul.f32 %v128_v2, %v128_v2  ;;  %v154_v8 = vmul.f32 %v129_v3, %v129_v3  ;;  %v131_v9 = vld [vmem:[%s108_s20 + $0x20] sm:$0xff]  ;;  %v132_v13 = vld [vmem:[%s108_s20 + $0x28] sm:$0xff] }
  0x3e   : > { %v155_v11 = vmul.f32 %v130_v4, %v130_v4  ;;  %v156_v15 = vmul.f32 %v131_v9, %v131_v9  ;;  %v133_v17 = vld [vmem:[%s108_s20 + $0x30] sm:$0xff]  ;;  %v157_v19 = vmul.f32 %v132_v13, %v132_v13  ;;  %v134_v21 = vld [vmem:[%s108_s20 + $0x38] sm:$0xff]  ;;  %v135_v40 = vld [vmem:[#allocation5] sm:$0x1] }
  0x3f   : > { %v137_v10 = vadd.f32 %v136_v5, %v129_v3  ;;  %v160_v12 = vadd.f32 %v153_v7, %v152_v6  ;;  %v158_v23 = vmul.f32 %v133_v17, %v133_v17  ;;  %v159_v26 = vmul.f32 %v134_v21, %v134_v21  ;;  %v151_v43 = vld [vmem:[#allocation5 + $0x1] sm:$0x1] }
  0x41   : > { %v138_v14 = vadd.f32 %v137_v10, %v130_v4  ;;  %v161_v16 = vadd.f32 %v160_v12, %v154_v8 }
  0x43   : > { %v139_v18 = vadd.f32 %v138_v14, %v131_v9  ;;  %v162_v20 = vadd.f32 %v161_v16, %v155_v11 }
  0x45   : > { %v140_v22 = vadd.f32 %v139_v18, %v132_v13  ;;  %v163_v24 = vadd.f32 %v162_v20, %v156_v15 }
  0x47   : > { %v141_v25 = vadd.f32 %v140_v22, %v133_v17  ;;  %v164_v27 = vadd.f32 %v163_v24, %v157_v19 }
  0x49   : > { %v142_v28 = vadd.f32 %v141_v25, %v134_v21  ;;  %v165_v29 = vadd.f32 %v164_v27, %v158_v23 }
  0x4b   : > { %v143_v30 = vrot.slane %v142_v28, 4  ;;  %v166_v31 = vadd.f32 %v165_v29, %v159_v26 }
  0x4d   : > { %v144_v32 = vadd.f32 %v143_v30, %v142_v28  ;;  %v167_v33 = vrot.slane %v166_v31, 4 }
  0x4f   : > { %v145_v34 = vrot.slane %v144_v32, 2  ;;  %v168_v35 = vadd.f32 %v167_v33, %v166_v31 }
  0x51   : > { %v146_v36 = vadd.f32 %v145_v34, %v144_v32  ;;  %v169_v37 = vrot.slane %v168_v35, 2 }
  0x53   : > { %v147_v38 = vrot.slane %v146_v36, 1  ;;  %v170_v39 = vadd.f32 %v169_v37, %v168_v35 }
  0x55   : > { %v148_v41 = vadd.f32 %v147_v38, %v146_v36  ;;  %v171_v42 = vrot.slane %v170_v39, 1  ;;  %178 = sbr.rel (%p254_p7) target bundleno = 117 (0x75), region = 36 }
  0x57   : > { %v149_v44 = vadd.f32 %v148_v41, %v135_v40  ;;  %v172_v45 = vadd.f32 %v171_v42, %v170_v39 }
  0x59   : > { %150 = vst [vmem:[#allocation5] sm:$0x1] %v149_v44  ;;  %v173_v46 = vadd.f32 %v172_v45, %v151_v43 }
  0x5b   : > { %174 = vst [vmem:[#allocation5 + $0x1] sm:$0x1] %v173_v46 }
  0x60   : > { %v179_v47 = vld [vmem:[#allocation5] sm:$0x1] }
  0x61   : > { %v180_v49 = vmul.f32 0.0078125, %v179_v47 }
  0x62   : > { %v181_v48 = vld [vmem:[#allocation5 + $0x1] sm:$0x1] }
  0x63   : > { %v182_v50 = vmul.f32 0.0078125, %v181_v48  ;;  %v183_v51 = vmul.f32 %v180_v49, %v180_v49  ;;  %185 = vst [vmem:[#allocation5] sm:$0x1] %v180_v49 }
  0x65   : > { %v184_v52 = vsub.f32 %v182_v50, %v183_v51 }
  0x67   : > { %v186_v53 = vadd.f32 1e-05, %v184_v52 }
  0x69   : > { %309 = vrsqrt.f32 %v186_v53 }
  0x73   : > { %v310_v54 = vpop.eup %309 }
  0x74   : > { %188 = vst [vmem:[#allocation5 + $0x1] sm:$0x1] %v310_v54 }
  0x75 PF: > { %p270_p8 = scmp.eq.s32.totalorder %s442_s10, 1  ;;  %s412_s9 = smov [#allocation5]  }
  0x76   : > { %s196_s15 = sshll.u32 %s412_s9, 4  ;;  %s197_s15 = int_to_ptr.vmem [resolvable:$true] %s196_s15 }
  0x77   : > { %s341_s21 = scalar_lea.vmem %s197_s15, 32  ;;  %p348_p9 = scmp.lt.s32.totalorder %s197_s15, %s197_s15 }
  0x78   : > { %p342_p4 = scmp.ne.s32.totalorder %s197_s15, %s341_s21  ;;  %p349_p11 = scmp.lt.s32.totalorder %s341_s21, %s341_s21 }
  0x7a   : > { %p343_p5 = pnand %p342_p4, %p270_p8  ;;  %p350_p13 = por %p349_p11, %p348_p9 }
  0x7c   : > { %p344_p6 = pneg %p343_p5 }
  0x7e   : > { %p351_p0 = pnand %p350_p13, %p344_p6 }
  0x80   : > { %354 = shalt.err (!%p351_p0)
}
  0x81   : > { %s355_s24 = scalar_lea.hbm %s550_s1, 32 }
  0x82   : > { %p356_p1 = scmp.ne.s32.totalorder %s550_s1, %s355_s24  ;;  %p361_p2 = scmp.lt.u32.totalorder %s355_s24, %s550_s1 }
  0x84   : > { %p357_p10 = pnand %p356_p1, %p270_p8 }
  0x86   : > { %p358_p12 = pneg %p357_p10 }
  0x88   : > { %p363_p3 = pnand %p361_p2, %p358_p12 }
  0x8a   : > { %366 = shalt.err (!%p363_p3)
}
  0x8b   : > { %262 = dma.vmem_to_hbm [thread:$0]  (%p270_p8), %s197_s15, 32, %s550_s1, [#allocation4]  }
  0x8c   : > { %388 = dma.done.wait (%p270_p8), [#allocation4], 32  }
  0x8d   : > { %390 = vsyncadd (%p270_p8), [#allocation4], 4294967264 }
  0x8e PF: > { %p12_p7 = scmp.ge.s32.totalorder %s445_s11, 4   ;;  %s553_s6 = smov %s397_s7 }
  0x8f   : > { %s554_s7 = smov %s401_s8  ;;  %s555_s8 = smov %s455_s14 }
  0x90   : > { %s556_s9 = smov %s445_s11  ;;  %14 = sbr.rel (!%p12_p7) target bundleno = 4 (0x4), region = 69 }
  0x97   :  { %209 = vsyncpa [#allocation3], 1 }
  0x98   :  { %211 = vsyncpa [#allocation3 + $0x1], 1 }
  0x99   :  { %212 = vsyncpa [#allocation4], 1 }
  0x9a   :  { %214 = vsyncpa [#allocation4 + $0x1], 1 }

</bundles_post_ra>
